<compile_context>
chip_gen: v7x
topology: tpu7x:2x2x1
jax: 0.10.0
libtpu: 0.0.40
codegen_flags: <defaults>
</compile_context>

<pallas_src>
import functools

import jax
import jax.numpy as jnp
from jax.experimental import pallas as pl
from jax.experimental.pallas import tpu as pltpu


def _rnn_fc_softmax_kernel(x_ref, wih_ref, whh_ref, b_ref, wfc_ref, bfc_ref,
                           probs_ref, hfinal_ref, *, B, T):
    """Single-invocation RNN + FC + softmax.

    x_ref:     (B*T, I)   batch-major flattened inputs (row = b*T + t)
    wih_ref:   (I, Hp)    W_ih^T, zero-padded to Hp lanes
    whh_ref:   (Hp, Hp)   W_hh^T, zero-padded
    b_ref:     (1, Hp)    b_ih + b_hh, zero-padded
    wfc_ref:   (Hp, OP)   W_fc^T, zero-padded
    bfc_ref:   (1, OP)    b_fc; padded lanes = -1e30 (softmax-neutral)
    probs_ref: (B*T, OP)  softmax rows, batch-major (row = b*T + t)
    hfinal_ref:(Bp, Hp)   final hidden state (padded; real block is [:B, :H])
    """
    Bp, Hp = hfinal_ref.shape

    # ---- Phase A: input projection for ALL timesteps, one MXU matmul.
    # Row order of the matmul is irrelevant, so x stays in its natural
    # batch-major layout (no HBM-side transpose anywhere).
    proj = (jnp.dot(x_ref[...], wih_ref[...],
                    preferred_element_type=jnp.float32) + b_ref[...])

    whh = whh_ref[...]
    zero_rows = jnp.zeros((Bp - B, Hp), jnp.float32)   # hoisted (no CSE in loop)

    # ---- Phase B: serial recurrence.  h is one lane/sublane-dense (Bp, Hp)
    # f32 vreg tile; padded rows/lanes remain exactly 0.  T is static & small,
    # so the loop is fully unrolled (LLO sees across timesteps).
    h = jnp.zeros((Bp, Hp), jnp.float32)
    hs = []
    for t in range(T):
        # Gather this timestep's projected rows (one per batch) from registers
        # via static slices -- no strided / masked VMEM traffic on the chain.
        xp = jnp.concatenate(
            [proj[b * T + t:b * T + t + 1, :] for b in range(B)] + [zero_rows],
            axis=0)                                           # (Bp, Hp)
        h = jnp.tanh(xp + jnp.dot(h, whh, preferred_element_type=jnp.float32))
        hs.append(h)

    hfinal_ref[...] = h.astype(hfinal_ref.dtype)              # dense full-tile store

    # ---- Phase C: FC + softmax over all timesteps at once.  Assemble the FC
    # input directly in batch-major row order (row = b*T + t) so the output
    # needs no reordering anywhere.
    h_bm = jnp.concatenate(
        [hs[t][b:b + 1, :] for b in range(B) for t in range(T)], axis=0)  # (B*T, Hp)
    logits = (jnp.dot(h_bm, wfc_ref[...], preferred_element_type=jnp.float32)
              + bfc_ref[...])
    m = jnp.max(logits, axis=-1, keepdims=True)
    e = jnp.exp(logits - m)                 # padded lanes: exp(-1e30 - m) == 0
    # Exact normalisation (off the critical path) -> rows sum to 1 to f32 eps.
    probs_ref[...] = (e / jnp.sum(e, axis=-1, keepdims=True)).astype(probs_ref.dtype)


def model_forward(x, params):
    """x: (B, T, I) float32. Returns (softmax_out (B*T, O), hidden (1, B, H))."""
    w_ih, w_hh, b_ih, b_hh, w_fc, b_fc = params
    B, T, I = x.shape
    H = w_ih.shape[0]
    O = w_fc.shape[0]
    Hp = max(128, ((H + 127) // 128) * 128)    # lane-dense hidden width
    OP = max(128, ((O + 127) // 128) * 128)    # lane-dense FC width
    Bp = max(8, ((B + 7) // 8) * 8)            # sublane-dense batch

    # Batch-major flattened input (row = b*T + t): a free reshape, no transpose.
    x_flat = x.reshape(B * T, I).astype(jnp.float32)

    # Zero-padded, pre-transposed weights (padding keeps results exact).
    wih_p = jnp.zeros((I, Hp), jnp.float32).at[:, :H].set(
        jnp.transpose(w_ih).astype(jnp.float32))
    whh_p = jnp.zeros((Hp, Hp), jnp.float32).at[:H, :H].set(
        jnp.transpose(w_hh).astype(jnp.float32))
    b_p = jnp.zeros((1, Hp), jnp.float32).at[0, :H].set(
        (b_ih + b_hh).astype(jnp.float32))
    wfc_p = jnp.zeros((Hp, OP), jnp.float32).at[:H, :O].set(
        jnp.transpose(w_fc).astype(jnp.float32))
    bfc_p = jnp.full((1, OP), -1e30, jnp.float32).at[0, :O].set(
        b_fc.astype(jnp.float32))

    # Everything is VMEM-resident for the whole (gridless) call; budget it.
    resident_bytes = 4 * (B * T * I + I * Hp + Hp * Hp + Hp + Hp * OP + OP
                          + B * T * OP + Bp * Hp)
    vmem_limit = int(min(96 * 2 ** 20, max(4 * 2 ** 20, 4 * resident_bytes)))

    cost = pl.CostEstimate(
        flops=2 * (B * T) * I * Hp + 2 * T * Bp * Hp * Hp + 2 * (B * T) * Hp * OP,
        transcendentals=T * Bp * Hp + (B * T) * OP,
        bytes_accessed=resident_bytes,
    )

    kernel = functools.partial(_rnn_fc_softmax_kernel, B=B, T=T)
    vmem = pltpu.MemorySpace.VMEM
    probs_pad, h_final_pad = pl.pallas_call(
        kernel,
        out_shape=(
            jax.ShapeDtypeStruct((B * T, OP), jnp.float32),
            jax.ShapeDtypeStruct((Bp, Hp), jnp.float32),
        ),
        in_specs=[pl.BlockSpec(memory_space=vmem) for _ in range(6)],
        out_specs=(pl.BlockSpec(memory_space=vmem),
                   pl.BlockSpec(memory_space=vmem)),
        compiler_params=pltpu.CompilerParams(vmem_limit_bytes=vmem_limit),
        cost_estimate=cost,
    )(x_flat, wih_p, whh_p, b_p, wfc_p, bfc_p)

    out = probs_pad[:, :O]                    # already batch-major (b*T + t)
    hidden = h_final_pad[:B, :H][None]        # (1, B, H) like nn.RNN
    return out, hidden


def _reference(x, params):
    """Pure-JAX reference with the same PyTorch semantics (f32, high precision)."""
    w_ih, w_hh, b_ih, b_hh, w_fc, b_fc = params
    B, T, _ = x.shape
    H = w_ih.shape[0]
    hi = jax.lax.Precision.HIGHEST
    h = jnp.zeros((B, H), jnp.float32)
    hs = []
    for t in range(T):
        h = jnp.tanh(jnp.dot(x[:, t, :], w_ih.T, precision=hi) + b_ih
                     + jnp.dot(h, w_hh.T, precision=hi) + b_hh)
        hs.append(h)
    flat = jnp.stack(hs, axis=1).reshape(B * T, H)    # batch-major row order
    logits = jnp.dot(flat, w_fc.T, precision=hi) + b_fc
    return jax.nn.softmax(logits, axis=1), h[None]


def init_params(key, input_size, hidden_dim, output_size):
    """Deterministic synthetic init mimicking PyTorch's U(-1/sqrt(H), 1/sqrt(H))."""
    ks = jax.random.split(key, 6)
    bound = 1.0 / jnp.sqrt(jnp.float32(hidden_dim))
    u = lambda k, shape: jax.random.uniform(k, shape, jnp.float32, -bound, bound)
    w_ih = u(ks[0], (hidden_dim, input_size))
    w_hh = u(ks[1], (hidden_dim, hidden_dim))
    b_ih = u(ks[2], (hidden_dim,))
    b_hh = u(ks[3], (hidden_dim,))
    w_fc = u(ks[4], (output_size, hidden_dim))
    b_fc = u(ks[5], (output_size,))
    return (w_ih, w_hh, b_ih, b_hh, w_fc, b_fc)


if __name__ == "__main__":
    B, T, I, H, O = 2, 8, 16, 32, 10
    key = jax.random.PRNGKey(0)
    kx, kp = jax.random.split(key)
    x = jax.random.normal(kx, (B, T, I), dtype=jnp.float32)
    params = init_params(kp, I, H, O)

    fwd = jax.jit(model_forward)
    out, hidden = fwd(x, params)
    out = jax.block_until_ready(out)
    hidden = jax.block_until_ready(hidden)

    assert out.shape == (B * T, O)
    assert hidden.shape == (1, B, H)
    # Exact softmax normalisation -> rows sum to 1 within f32 rounding.
    assert bool(jnp.allclose(jnp.sum(out, axis=1), 1.0, atol=1e-3))

    ref_out, ref_hidden = _reference(x, params)
    assert bool(jnp.allclose(out, ref_out, atol=5e-3, rtol=5e-3))
    assert bool(jnp.allclose(hidden, ref_hidden, atol=2e-3, rtol=2e-3))

    print("KERNEL_OK")
</pallas_src>

<mosaic_0001>
module attributes {stable_mosaic.version = 11 : i64} {
  func.func @_rnn_fc_softmax_kernel(%arg0: memref<16x16xf32, #tpu.memory_space<vmem>>, %arg1: memref<16x128xf32, #tpu.memory_space<vmem>>, %arg2: memref<128x128xf32, #tpu.memory_space<vmem>>, %arg3: memref<1x128xf32, #tpu.memory_space<vmem>>, %arg4: memref<128x128xf32, #tpu.memory_space<vmem>>, %arg5: memref<1x128xf32, #tpu.memory_space<vmem>>, %arg6: memref<16x128xf32, #tpu.memory_space<vmem>>, %arg7: memref<8x128xf32, #tpu.memory_space<vmem>>) attributes {dimension_semantics = [], scalar_prefetch = 0 : i64, scratch_operands = 0 : i64, tpu.core_type = #tpu.core_type<tc>} {
    %c0 = arith.constant 0 : index
    %c0_0 = arith.constant 0 : index
    %0 = vector.load %arg0[%c0, %c0_0] : memref<16x16xf32, #tpu.memory_space<vmem>>, vector<16x16xf32>
    %c0_1 = arith.constant 0 : index
    %c0_2 = arith.constant 0 : index
    %1 = vector.load %arg1[%c0_1, %c0_2] : memref<16x128xf32, #tpu.memory_space<vmem>>, vector<16x128xf32>
    %cst = arith.constant dense<0.000000e+00> : vector<16x128xf32>
    %2 = tpu.matmul %0, %1, %cst {dimension_numbers = #tpu.dot_dimension_numbers<[1], [0], [0], [1], [0, 0, 1, 1], [], []>} : vector<16x16xf32>, vector<16x128xf32>, vector<16x128xf32> -> vector<16x128xf32>
    %c0_3 = arith.constant 0 : index
    %c0_4 = arith.constant 0 : index
    %3 = vector.load %arg3[%c0_3, %c0_4] : memref<1x128xf32, #tpu.memory_space<vmem>>, vector<1x128xf32>
    %4 = vector.broadcast %3 : vector<1x128xf32> to vector<16x128xf32>
    %5 = arith.addf %2, %4 : vector<16x128xf32>
    %c0_5 = arith.constant 0 : index
    %c0_6 = arith.constant 0 : index
    %6 = vector.load %arg2[%c0_5, %c0_6] : memref<128x128xf32, #tpu.memory_space<vmem>>, vector<128x128xf32>
    %cst_7 = arith.constant 0.000000e+00 : f32
    %7 = vector.broadcast %cst_7 : f32 to vector<6x128xf32>
    %cst_8 = arith.constant 0.000000e+00 : f32
    %8 = vector.broadcast %cst_8 : f32 to vector<8x128xf32>
    %9 = vector.extract_strided_slice %5 {offsets = [0, 0], sizes = [1, 128], strides = [1, 1]} : vector<16x128xf32> to vector<1x128xf32>
    %10 = vector.extract_strided_slice %5 {offsets = [8, 0], sizes = [1, 128], strides = [1, 1]} : vector<16x128xf32> to vector<1x128xf32>
    %11 = tpu.concatenate %9, %10, %7 in 0 : vector<1x128xf32>, vector<1x128xf32>, vector<6x128xf32> -> vector<8x128xf32>
    %cst_9 = arith.constant dense<0.000000e+00> : vector<8x128xf32>
    %12 = tpu.matmul %8, %6, %cst_9 {dimension_numbers = #tpu.dot_dimension_numbers<[1], [0], [0], [1], [0, 0, 1, 1], [], []>} : vector<8x128xf32>, vector<128x128xf32>, vector<8x128xf32> -> vector<8x128xf32>
    %13 = arith.addf %11, %12 : vector<8x128xf32>
    %14 = math.tanh %13 : vector<8x128xf32>
    %15 = vector.extract_strided_slice %5 {offsets = [1, 0], sizes = [1, 128], strides = [1, 1]} : vector<16x128xf32> to vector<1x128xf32>
    %16 = vector.extract_strided_slice %5 {offsets = [9, 0], sizes = [1, 128], strides = [1, 1]} : vector<16x128xf32> to vector<1x128xf32>
    %17 = tpu.concatenate %15, %16, %7 in 0 : vector<1x128xf32>, vector<1x128xf32>, vector<6x128xf32> -> vector<8x128xf32>
    %cst_10 = arith.constant dense<0.000000e+00> : vector<8x128xf32>
    %18 = tpu.matmul %14, %6, %cst_10 {dimension_numbers = #tpu.dot_dimension_numbers<[1], [0], [0], [1], [0, 0, 1, 1], [], []>} : vector<8x128xf32>, vector<128x128xf32>, vector<8x128xf32> -> vector<8x128xf32>
    %19 = arith.addf %17, %18 : vector<8x128xf32>
    %20 = math.tanh %19 : vector<8x128xf32>
    %21 = vector.extract_strided_slice %5 {offsets = [2, 0], sizes = [1, 128], strides = [1, 1]} : vector<16x128xf32> to vector<1x128xf32>
    %22 = vector.extract_strided_slice %5 {offsets = [10, 0], sizes = [1, 128], strides = [1, 1]} : vector<16x128xf32> to vector<1x128xf32>
    %23 = tpu.concatenate %21, %22, %7 in 0 : vector<1x128xf32>, vector<1x128xf32>, vector<6x128xf32> -> vector<8x128xf32>
    %cst_11 = arith.constant dense<0.000000e+00> : vector<8x128xf32>
    %24 = tpu.matmul %20, %6, %cst_11 {dimension_numbers = #tpu.dot_dimension_numbers<[1], [0], [0], [1], [0, 0, 1, 1], [], []>} : vector<8x128xf32>, vector<128x128xf32>, vector<8x128xf32> -> vector<8x128xf32>
    %25 = arith.addf %23, %24 : vector<8x128xf32>
    %26 = math.tanh %25 : vector<8x128xf32>
    %27 = vector.extract_strided_slice %5 {offsets = [3, 0], sizes = [1, 128], strides = [1, 1]} : vector<16x128xf32> to vector<1x128xf32>
    %28 = vector.extract_strided_slice %5 {offsets = [11, 0], sizes = [1, 128], strides = [1, 1]} : vector<16x128xf32> to vector<1x128xf32>
    %29 = tpu.concatenate %27, %28, %7 in 0 : vector<1x128xf32>, vector<1x128xf32>, vector<6x128xf32> -> vector<8x128xf32>
    %cst_12 = arith.constant dense<0.000000e+00> : vector<8x128xf32>
    %30 = tpu.matmul %26, %6, %cst_12 {dimension_numbers = #tpu.dot_dimension_numbers<[1], [0], [0], [1], [0, 0, 1, 1], [], []>} : vector<8x128xf32>, vector<128x128xf32>, vector<8x128xf32> -> vector<8x128xf32>
    %31 = arith.addf %29, %30 : vector<8x128xf32>
    %32 = math.tanh %31 : vector<8x128xf32>
    %33 = vector.extract_strided_slice %5 {offsets = [4, 0], sizes = [1, 128], strides = [1, 1]} : vector<16x128xf32> to vector<1x128xf32>
    %34 = vector.extract_strided_slice %5 {offsets = [12, 0], sizes = [1, 128], strides = [1, 1]} : vector<16x128xf32> to vector<1x128xf32>
    %35 = tpu.concatenate %33, %34, %7 in 0 : vector<1x128xf32>, vector<1x128xf32>, vector<6x128xf32> -> vector<8x128xf32>
    %cst_13 = arith.constant dense<0.000000e+00> : vector<8x128xf32>
    %36 = tpu.matmul %32, %6, %cst_13 {dimension_numbers = #tpu.dot_dimension_numbers<[1], [0], [0], [1], [0, 0, 1, 1], [], []>} : vector<8x128xf32>, vector<128x128xf32>, vector<8x128xf32> -> vector<8x128xf32>
    %37 = arith.addf %35, %36 : vector<8x128xf32>
    %38 = math.tanh %37 : vector<8x128xf32>
    %39 = vector.extract_strided_slice %5 {offsets = [5, 0], sizes = [1, 128], strides = [1, 1]} : vector<16x128xf32> to vector<1x128xf32>
    %40 = vector.extract_strided_slice %5 {offsets = [13, 0], sizes = [1, 128], strides = [1, 1]} : vector<16x128xf32> to vector<1x128xf32>
    %41 = tpu.concatenate %39, %40, %7 in 0 : vector<1x128xf32>, vector<1x128xf32>, vector<6x128xf32> -> vector<8x128xf32>
    %cst_14 = arith.constant dense<0.000000e+00> : vector<8x128xf32>
    %42 = tpu.matmul %38, %6, %cst_14 {dimension_numbers = #tpu.dot_dimension_numbers<[1], [0], [0], [1], [0, 0, 1, 1], [], []>} : vector<8x128xf32>, vector<128x128xf32>, vector<8x128xf32> -> vector<8x128xf32>
    %43 = arith.addf %41, %42 : vector<8x128xf32>
    %44 = math.tanh %43 : vector<8x128xf32>
    %45 = vector.extract_strided_slice %5 {offsets = [6, 0], sizes = [1, 128], strides = [1, 1]} : vector<16x128xf32> to vector<1x128xf32>
    %46 = vector.extract_strided_slice %5 {offsets = [14, 0], sizes = [1, 128], strides = [1, 1]} : vector<16x128xf32> to vector<1x128xf32>
    %47 = tpu.concatenate %45, %46, %7 in 0 : vector<1x128xf32>, vector<1x128xf32>, vector<6x128xf32> -> vector<8x128xf32>
    %cst_15 = arith.constant dense<0.000000e+00> : vector<8x128xf32>
    %48 = tpu.matmul %44, %6, %cst_15 {dimension_numbers = #tpu.dot_dimension_numbers<[1], [0], [0], [1], [0, 0, 1, 1], [], []>} : vector<8x128xf32>, vector<128x128xf32>, vector<8x128xf32> -> vector<8x128xf32>
    %49 = arith.addf %47, %48 : vector<8x128xf32>
    %50 = math.tanh %49 : vector<8x128xf32>
    %51 = vector.extract_strided_slice %5 {offsets = [7, 0], sizes = [1, 128], strides = [1, 1]} : vector<16x128xf32> to vector<1x128xf32>
    %52 = vector.extract_strided_slice %5 {offsets = [15, 0], sizes = [1, 128], strides = [1, 1]} : vector<16x128xf32> to vector<1x128xf32>
    %53 = tpu.concatenate %51, %52, %7 in 0 : vector<1x128xf32>, vector<1x128xf32>, vector<6x128xf32> -> vector<8x128xf32>
    %cst_16 = arith.constant dense<0.000000e+00> : vector<8x128xf32>
    %54 = tpu.matmul %50, %6, %cst_16 {dimension_numbers = #tpu.dot_dimension_numbers<[1], [0], [0], [1], [0, 0, 1, 1], [], []>} : vector<8x128xf32>, vector<128x128xf32>, vector<8x128xf32> -> vector<8x128xf32>
    %55 = arith.addf %53, %54 : vector<8x128xf32>
    %56 = math.tanh %55 : vector<8x128xf32>
    %c0_17 = arith.constant 0 : index
    %c0_18 = arith.constant 0 : index
    %57 = vector.load %arg7[%c0_17, %c0_18] : memref<8x128xf32, #tpu.memory_space<vmem>>, vector<8x128xf32>
    tpu.vector_store %arg7[%c0_17, %c0_18], %56 {strides = array<i32>} : memref<8x128xf32, #tpu.memory_space<vmem>>, vector<8x128xf32>,
    %58 = vector.extract_strided_slice %14 {offsets = [0, 0], sizes = [1, 128], strides = [1, 1]} : vector<8x128xf32> to vector<1x128xf32>
    %59 = vector.extract_strided_slice %20 {offsets = [0, 0], sizes = [1, 128], strides = [1, 1]} : vector<8x128xf32> to vector<1x128xf32>
    %60 = vector.extract_strided_slice %26 {offsets = [0, 0], sizes = [1, 128], strides = [1, 1]} : vector<8x128xf32> to vector<1x128xf32>
    %61 = vector.extract_strided_slice %32 {offsets = [0, 0], sizes = [1, 128], strides = [1, 1]} : vector<8x128xf32> to vector<1x128xf32>
    %62 = vector.extract_strided_slice %38 {offsets = [0, 0], sizes = [1, 128], strides = [1, 1]} : vector<8x128xf32> to vector<1x128xf32>
    %63 = vector.extract_strided_slice %44 {offsets = [0, 0], sizes = [1, 128], strides = [1, 1]} : vector<8x128xf32> to vector<1x128xf32>
    %64 = vector.extract_strided_slice %50 {offsets = [0, 0], sizes = [1, 128], strides = [1, 1]} : vector<8x128xf32> to vector<1x128xf32>
    %65 = vector.extract_strided_slice %56 {offsets = [0, 0], sizes = [1, 128], strides = [1, 1]} : vector<8x128xf32> to vector<1x128xf32>
    %66 = vector.extract_strided_slice %14 {offsets = [1, 0], sizes = [1, 128], strides = [1, 1]} : vector<8x128xf32> to vector<1x128xf32>
    %67 = vector.extract_strided_slice %20 {offsets = [1, 0], sizes = [1, 128], strides = [1, 1]} : vector<8x128xf32> to vector<1x128xf32>
    %68 = vector.extract_strided_slice %26 {offsets = [1, 0], sizes = [1, 128], strides = [1, 1]} : vector<8x128xf32> to vector<1x128xf32>
    %69 = vector.extract_strided_slice %32 {offsets = [1, 0], sizes = [1, 128], strides = [1, 1]} : vector<8x128xf32> to vector<1x128xf32>
    %70 = vector.extract_strided_slice %38 {offsets = [1, 0], sizes = [1, 128], strides = [1, 1]} : vector<8x128xf32> to vector<1x128xf32>
    %71 = vector.extract_strided_slice %44 {offsets = [1, 0], sizes = [1, 128], strides = [1, 1]} : vector<8x128xf32> to vector<1x128xf32>
    %72 = vector.extract_strided_slice %50 {offsets = [1, 0], sizes = [1, 128], strides = [1, 1]} : vector<8x128xf32> to vector<1x128xf32>
    %73 = vector.extract_strided_slice %56 {offsets = [1, 0], sizes = [1, 128], strides = [1, 1]} : vector<8x128xf32> to vector<1x128xf32>
    %74 = tpu.concatenate %58, %59, %60, %61, %62, %63, %64, %65, %66, %67, %68, %69, %70, %71, %72, %73 in 0 : vector<1x128xf32>, vector<1x128xf32>, vector<1x128xf32>, vector<1x128xf32>, vector<1x128xf32>, vector<1x128xf32>, vector<1x128xf32>, vector<1x128xf32>, vector<1x128xf32>, vector<1x128xf32>, vector<1x128xf32>, vector<1x128xf32>, vector<1x128xf32>, vector<1x128xf32>, vector<1x128xf32>, vector<1x128xf32> -> vector<16x128xf32>
    %c0_19 = arith.constant 0 : index
    %c0_20 = arith.constant 0 : index
    %75 = vector.load %arg4[%c0_19, %c0_20] : memref<128x128xf32, #tpu.memory_space<vmem>>, vector<128x128xf32>
    %cst_21 = arith.constant dense<0.000000e+00> : vector<16x128xf32>
    %76 = tpu.matmul %74, %75, %cst_21 {dimension_numbers = #tpu.dot_dimension_numbers<[1], [0], [0], [1], [0, 0, 1, 1], [], []>} : vector<16x128xf32>, vector<128x128xf32>, vector<16x128xf32> -> vector<16x128xf32>
    %c0_22 = arith.constant 0 : index
    %c0_23 = arith.constant 0 : index
    %77 = vector.load %arg5[%c0_22, %c0_23] : memref<1x128xf32, #tpu.memory_space<vmem>>, vector<1x128xf32>
    %78 = vector.broadcast %77 : vector<1x128xf32> to vector<16x128xf32>
    %79 = arith.addf %76, %78 : vector<16x128xf32>
    %cst_24 = arith.constant dense<0xFF800000> : vector<16xf32>
    %80 = vector.multi_reduction <maximumf>, %79, %cst_24 [1] : vector<16x128xf32> to vector<16xf32>
    %81 = vector.shape_cast %80 : vector<16xf32> to vector<16x1xf32>
    %82 = vector.broadcast %81 : vector<16x1xf32> to vector<16x128xf32>
    %83 = arith.subf %79, %82 : vector<16x128xf32>
    %84 = math.exp %83 : vector<16x128xf32>
    %cst_25 = arith.constant dense<0.000000e+00> : vector<16xf32>
    %85 = vector.multi_reduction <add>, %84, %cst_25 [1] : vector<16x128xf32> to vector<16xf32>
    %86 = vector.shape_cast %85 : vector<16xf32> to vector<16x1xf32>
    %87 = vector.broadcast %86 : vector<16x1xf32> to vector<16x128xf32>
    %88 = arith.divf %84, %87 : vector<16x128xf32>
    %c0_26 = arith.constant 0 : index
    %c0_27 = arith.constant 0 : index
    %89 = vector.load %arg6[%c0_26, %c0_27] : memref<16x128xf32, #tpu.memory_space<vmem>>, vector<16x128xf32>
    tpu.vector_store %arg6[%c0_26, %c0_27], %88 {strides = array<i32>} : memref<16x128xf32, #tpu.memory_space<vmem>>, vector<16x128xf32>,
    return
  }
}

</mosaic_0001>

<bundles_post_ra>
// kernel: model_forward.1
= control target key start
LH: loop header
LB: loop body
LE: loop exit
PB: predicated region body
PF: predicated region fallthrough
CT: control target
= control target key end

     0   :  { %v1719_v3 = vmov 0.0|0.0   ;;  %vm37_vm0 = vcmask 130048   ;;  %vm1720_vm1 = vmmov 0   ;;  %v1721_v6 = vmov 0.0   ;;  %s2092_s0 = inlined_call_operand.vmem [shape: f32[16,16], index: 0, kind: input, shape index: {}]   ;;  %s2093_s1 = inlined_call_operand.vmem [shape: f32[16,128], index: 1, kind: input, shape index: {}]   ;;  %s2094_s2 = inlined_call_operand.vmem [shape: f32[128,128], index: 2, kind: input, shape index: {}]   ;;  %s2095_s3 = inlined_call_operand.vmem [shape: f32[1,128], index: 3, kind: input, shape index: {}]   ;;  %s2096_s4 = inlined_call_operand.vmem [shape: f32[128,128], index: 4, kind: input, shape index: {}]   ;;  %s2097_s5 = inlined_call_operand.vmem [shape: f32[1,128], index: 5, kind: input, shape index: {}]   ;;  %s2098_s6 = inlined_call_operand.hbm [shape: f32[16,128], index: 6, kind: output, shape index: {0}]   ;;  %s2099_s7 = inlined_call_operand.vmem [shape: f32[8,128], index: 7, kind: output, shape index: {1}]  }
   0x1   :  { %v119_v0 = vld [vmem:[%s2094_s2] sm:$0xff]  ;;  %v120_v1 = vld [vmem:[%s2094_s2 + $0x8] sm:$0xff]  ;;  %v121_v2 = vld [vmem:[%s2094_s2 + $0x10] sm:$0xff]  ;;  %1441 = vmatprep.subr.bf16.mxu1 %v1719_v3  ;;  %1154 = vmatprep.mubr.msk.f32.mxu1 %vm1720_vm1, %v1721_v6 }
   0x2   :  { %v1775_v4 = vpack.c.bf16 %v120_v1, %v119_v0  ;;  %v122_v5 = vld [vmem:[%s2094_s2 + $0x18] sm:$0xff]  ;;  %v28_v8 = vld [vmem:[%s2093_s1] sm:$0xff]  ;;  %v29_v9 = vld [vmem:[%s2093_s1 + $0x8] sm:$0xff] }
   0x3   :  { %v1783_v7 = vpack.c.bf16 %v122_v5, %v121_v2  ;;  %v123_v10 = vld [vmem:[%s2094_s2 + $0x20] sm:$0xff]  ;;  %v124_v11 = vld [vmem:[%s2094_s2 + $0x28] sm:$0xff]  ;;  %v1437_v12 = vpack.c.bf16 %v29_v9, %v28_v8 }
   0x4   :  { %1443 = vmatpush3.bf16.msra.mxu1 %v1775_v4  ;;  %v26_v13 = vld [vmem:[%s2092_s0] sm:$0xff] }
   0x5   :  { %1444 = vmatprep.subr.bf16.mxu1 %v1719_v3  ;;  %1119 = vmatprep.mubr.msk.f32.mxu0 %vm37_vm0, %v26_v13 }
   0x6   :  { %1438 = vmatprep.subr.bf16.mxu0 %v1437_v12 }
   0x7   :  { %13 = vsyncpa [#allocation3], 0  ;;  %v1803_v14 = vpack.c.bf16 %v124_v11, %v123_v10  ;;  %1440 = vmatpush3.bf16.msra.mxu0 %v1437_v12  ;;  %v27_v15 = vld [vmem:[%s2092_s0 + $0x8] sm:$0xff]  ;;  %v125_v16 = vld [vmem:[%s2094_s2 + $0x30] sm:$0xff]  ;;  %vm138_vm2 = vcmask 1040384   ;;  %vm140_vm3 = vcmask 1041408  }
   0x8   :  { %1446 = vmatpush3.bf16.msra.mxu1 %v1783_v7  ;;  %v126_v17 = vld [vmem:[%s2094_s2 + $0x38] sm:$0xff]  ;;  %1465 = vmatprep.subr.bf16.mxu0 %v1719_v3  ;;  %v127_v19 = vld [vmem:[%s2094_s2 + $0x40] sm:$0xff]  ;;  %v128_v20 = vld [vmem:[%s2094_s2 + $0x48] sm:$0xff]  ;;  %vm798_vm4 = vcmask 1042432   ;;  %vm800_vm5 = vcmask 1043456   ;;  %vm802_vm6 = vcmask 1044480  }
   0x9   :  { %1447 = vmatprep.subr.bf16.mxu1 %v1719_v3  ;;  %v1818_v18 = vpack.c.bf16 %v126_v17, %v125_v16  ;;  %v1832_v21 = vpack.c.bf16 %v128_v20, %v127_v19  ;;  %v129_v22 = vld [vmem:[%s2094_s2 + $0x50] sm:$0xff]  ;;  %v130_v23 = vld [vmem:[%s2094_s2 + $0x58] sm:$0xff]  ;;  %v131_v25 = vld [vmem:[%s2094_s2 + $0x60] sm:$0xff]  ;;  %vm804_vm7 = vcmask 1045504   ;;  %vm806_vm8 = vcmask 1046528  }
   0xa   :  { %1120 = vmatmul.mubr.msk.f32.vlgmr.msra.gmra.mrb[0].mxu0 %vm37_vm0, %v27_v15  ;;  %v1844_v24 = vpack.c.bf16 %v130_v23, %v129_v22  ;;  %v132_v26 = vld [vmem:[%s2094_s2 + $0x68] sm:$0xff]  ;;  %v133_v28 = vld [vmem:[%s2094_s2 + $0x70] sm:$0xff]  ;;  %v134_v29 = vld [vmem:[%s2094_s2 + $0x78] sm:$0xff] }
   0xb   :  { %1467 = vmatpush3.bf16.msra.mxu0 %v1775_v4  ;;  %1189 = vmatprep.mubr.msk.f32.mxu0 %vm1720_vm1, %v1721_v6  ;;  %v1856_v27 = vpack.c.bf16 %v132_v26, %v131_v25  ;;  %v1868_v30 = vpack.c.bf16 %v134_v29, %v133_v28  ;;  %v953_v31 = vld [vmem:[%s2095_s3] ss:$0 sm:$0xff] }
   0xc   :  { %1449 = vmatpush3.bf16.msra.mxu1 %v1803_v14  ;;  %1468 = vmatprep.subr.bf16.mxu0 %v1719_v3 }
   0xd   :  { %1450 = vmatprep.subr.bf16.mxu1 %v1719_v3 }
   0xf   :  { %1470 = vmatpush3.bf16.msra.mxu0 %v1783_v7 }
  0x10   :  { %1452 = vmatpush3.bf16.msra.mxu1 %v1818_v18  ;;  %1471 = vmatprep.subr.bf16.mxu0 %v1719_v3 }
  0x11   :  { %1453 = vmatprep.subr.bf16.mxu1 %v1719_v3 }
  0x13   :  { %1473 = vmatpush3.bf16.msra.mxu0 %v1803_v14 }
  0x14   :  { %1455 = vmatpush3.bf16.msra.mxu1 %v1832_v21  ;;  %1474 = vmatprep.subr.bf16.mxu0 %v1719_v3 }
  0x15   :  { %1456 = vmatprep.subr.bf16.mxu1 %v1719_v3 }
  0x17   :  { %1476 = vmatpush3.bf16.msra.mxu0 %v1818_v18 }
  0x18   :  { %1458 = vmatpush3.bf16.msra.mxu1 %v1844_v24  ;;  %1477 = vmatprep.subr.bf16.mxu0 %v1719_v3 }
  0x19   :  { %1459 = vmatprep.subr.bf16.mxu1 %v1719_v3 }
  0x1b   :  { %1479 = vmatpush3.bf16.msra.mxu0 %v1832_v21 }
  0x1c   :  { %1461 = vmatpush3.bf16.msra.mxu1 %v1856_v27  ;;  %1480 = vmatprep.subr.bf16.mxu0 %v1719_v3 }
  0x1d   :  { %1462 = vmatprep.subr.bf16.mxu1 %v1719_v3 }
  0x1f   :  { %1482 = vmatpush3.bf16.msra.mxu0 %v1844_v24 }
  0x20   :  { %1464 = vmatpush3.bf16.msra.mxu1 %v1868_v30  ;;  %1483 = vmatprep.subr.bf16.mxu0 %v1719_v3 }
  0x21   :  { %1489 = vmatprep.subr.bf16.mxu1 %v1719_v3 }
  0x23   :  { %1155 = vmatmul.mubr.f32.vlgmr.msra.gmra.mrb[0].mxu1 %v1721_v6  ;;  %1485 = vmatpush3.bf16.msra.mxu0 %v1856_v27 }
  0x24   :  { %1491 = vmatpush3.bf16.msra.mxu1 %v1775_v4  ;;  %1486 = vmatprep.subr.bf16.mxu0 %v1719_v3 }
  0x25   :  { %1492 = vmatprep.subr.bf16.mxu1 %v1719_v3  ;;  %1224 = vmatprep.mubr.msk.f32.mxu1 %vm1720_vm1, %v1721_v6 }
  0x27   :  { %1488 = vmatpush3.bf16.msra.mxu0 %v1868_v30 }
  0x28   :  { %1494 = vmatpush3.bf16.msra.mxu1 %v1783_v7  ;;  %1513 = vmatprep.subr.bf16.mxu0 %v1719_v3 }
  0x29   :  { %1495 = vmatprep.subr.bf16.mxu1 %v1719_v3 }
  0x2c   :  { %1497 = vmatpush3.bf16.msra.mxu1 %v1803_v14 }
  0x2d   :  { %1498 = vmatprep.subr.bf16.mxu1 %v1719_v3 }
  0x30   :  { %1500 = vmatpush3.bf16.msra.mxu1 %v1818_v18 }
  0x31   :  { %1501 = vmatprep.subr.bf16.mxu1 %v1719_v3 }
  0x34   :  { %1503 = vmatpush3.bf16.msra.mxu1 %v1832_v21 }
  0x35   :  { %1504 = vmatprep.subr.bf16.mxu1 %v1719_v3 }
  0x38   :  { %1506 = vmatpush3.bf16.msra.mxu1 %v1844_v24 }
  0x39   :  { %1507 = vmatprep.subr.bf16.mxu1 %v1719_v3 }
  0x3c   :  { %1509 = vmatpush3.bf16.msra.mxu1 %v1856_v27 }
  0x3d   :  { %1510 = vmatprep.subr.bf16.mxu1 %v1719_v3 }
  0x40   :  { %1512 = vmatpush3.bf16.msra.mxu1 %v1868_v30 }
  0x41   :  { %1537 = vmatprep.subr.bf16.mxu1 %v1719_v3 }
  0xdd   :  { %v1121_v32 = vpop.f32.mrb[0].mxu0 }
  0xde   :  { %v116_v33 = vadd.f32 %v1121_v32, %v953_v31  ;;  %v110_v34 = vpop.f32.mrb[1].mxu0 }
  0xdf   :  { %v111_v35 = vadd.f32 %v953_v31, %v110_v34 }
  0xe0   :  { %v136_v36 = vrot.slane %v116_v33, 7  ;;  %v293_v37 = vrot.slane %v116_v33, 1  ;;  %v371_v38 = vrot.slane %v116_v33, 2  ;;  %v449_v39 = vrot.slane %v116_v33, 3 }
  0xe1   :  { %v215_v40 = vrot.slane %v111_v35, 1  ;;  %v291_v41 = vrot.slane %v111_v35, 2  ;;  %v369_v42 = vrot.slane %v111_v35, 3  ;;  %v447_v43 = vrot.slane %v111_v35, 4 }
  0xe2   :  { %v139_v44 = vsel %vm138_vm2, %v111_v35, %v136_v36  ;;  %v525_v45 = vrot.slane %v111_v35, 5  ;;  %v527_v46 = vrot.slane %v116_v33, 4  ;;  %v603_v50 = vrot.slane %v111_v35, 6 }
  0xe3   :  { %v217_v47 = vsel %vm138_vm2, %v215_v40, %v116_v33  ;;  %v295_v48 = vsel %vm138_vm2, %v291_v41, %v293_v37  ;;  %v1907_v49 = vsel %vm138_vm2, %v369_v42, %v371_v38  ;;  %v1910_v51 = vsel %vm138_vm2, %v447_v43, %v449_v39 }
  0xe4   :  { %v1913_v52 = vsel %vm138_vm2, %v525_v45, %v527_v46  ;;  %v605_v53 = vrot.slane %v116_v33, 5  ;;  %v681_v54 = vrot.slane %v111_v35, 7  ;;  %v683_v55 = vrot.slane %v116_v33, 6 }
  0xe5   :  { %v141_v58 = vsel %vm140_vm3, %v139_v44, 0.0  ;;  %v218_v63 = vsel %vm140_vm3, %v217_v47, 0.0  ;;  %v296_v8 = vsel %vm140_vm3, %v295_v48, 0.0  ;;  %v374_v25 = vsel %vm140_vm3, %v1907_v49, 0.0  ;;  %v818_v48 = vld [vmem:[%s2096_s4 + $0x18] sm:$0xff] }
  0xe6   :  { %v1916_v56 = vsel %vm138_vm2, %v603_v50, %v605_v53  ;;  %v1919_v57 = vsel %vm138_vm2, %v681_v54, %v683_v55  ;;  %v452_v36 = vsel %vm140_vm3, %v1910_v51, 0.0  ;;  %v819_v50 = vld [vmem:[%s2096_s4 + $0x20] sm:$0xff]  ;;  %v820_v51 = vld [vmem:[%s2096_s4 + $0x28] sm:$0xff]  ;;  %v821_v53 = vld [vmem:[%s2096_s4 + $0x30] sm:$0xff] }
  0xe7   :  { %v822_v54 = vld [vmem:[%s2096_s4 + $0x38] sm:$0xff] }
  0xe8   :  { %v1645_v55 = vpack.c.bf16 %v822_v54, %v821_v53 }
  0xf6   :  { %v208_v59 = vpop.f32.mrb[0].mxu1 }
  0xf7   :  { %v212_v60 = vadd.f32 %v208_v59, %v141_v58  ;;  %v1156_v61 = vpop.f32.mrb[1].mxu1  ;;  %v608_v58 = vsel %vm140_vm3, %v1916_v56, 0.0 }
  0xf9   :  { %1671 = vtanh.f32 %v212_v60 }
 0x103   :  { %v1672_v62 = vpop.eup %1671 }
 0x104   :  { %1190 = vmatmul.mubr.f32.vlgmr.msra.gmra.mrb[2].mxu0 %v1672_v62  ;;  %v782_v15 = vrot.slane %v1672_v62, 1 }
 0x105   :  { %1515 = vmatpush3.bf16.msra.mxu0 %v1775_v4  ;;  %1259 = vmatprep.mubr.msk.f32.mxu0 %vm1720_vm1, %v1721_v6 }
 0x106   :  { %1516 = vmatprep.subr.bf16.mxu0 %v1719_v3 }
 0x109   :  { %1518 = vmatpush3.bf16.msra.mxu0 %v1783_v7 }
 0x10a   :  { %1519 = vmatprep.subr.bf16.mxu0 %v1719_v3 }
 0x10d   :  { %1521 = vmatpush3.bf16.msra.mxu0 %v1803_v14 }
 0x10e   :  { %1522 = vmatprep.subr.bf16.mxu0 %v1719_v3 }
 0x111   :  { %1524 = vmatpush3.bf16.msra.mxu0 %v1818_v18 }
 0x112   :  { %1525 = vmatprep.subr.bf16.mxu0 %v1719_v3 }
 0x115   :  { %1527 = vmatpush3.bf16.msra.mxu0 %v1832_v21 }
 0x116   :  { %1528 = vmatprep.subr.bf16.mxu0 %v1719_v3 }
 0x119   :  { %1530 = vmatpush3.bf16.msra.mxu0 %v1844_v24 }
 0x11a   :  { %1531 = vmatprep.subr.bf16.mxu0 %v1719_v3 }
 0x11d   :  { %1533 = vmatpush3.bf16.msra.mxu0 %v1856_v27 }
 0x11e   :  { %1534 = vmatprep.subr.bf16.mxu0 %v1719_v3 }
 0x121   :  { %1536 = vmatpush3.bf16.msra.mxu0 %v1868_v30 }
 0x122   :  { %1561 = vmatprep.subr.bf16.mxu0 %v1719_v3 }
 0x1d7   :  { %v285_v0 = vpop.f32.mrb[2].mxu0 }
 0x1d8   :  { %v289_v1 = vadd.f32 %v285_v0, %v218_v63  ;;  %v1191_v2 = vpop.f32.mrb[3].mxu0 }
 0x1da   :  { %1673 = vtanh.f32 %v289_v1 }
 0x1e4   :  { %v1674_v5 = vpop.eup %1673 }
 0x1e5   :  { %1225 = vmatmul.mubr.f32.vlgmr.msra.gmra.mrb[2].mxu1 %v1674_v5  ;;  %v761_v12 = vrot.slane %v1674_v5, 7  ;;  %v808_v20 = vsel %vm138_vm2, %v782_v15, %v1674_v5  ;;  %v823_v5 = vld [vmem:[%s2096_s4 + $0x40] sm:$0xff] }
 0x1e6   :  { %1539 = vmatpush3.bf16.msra.mxu1 %v1775_v4  ;;  %1294 = vmatprep.mubr.msk.f32.mxu1 %vm1720_vm1, %v1721_v6 }
 0x1e7   :  { %1540 = vmatprep.subr.bf16.mxu1 %v1719_v3  ;;  %v796_v19 = vsel %vm138_vm2, %v1672_v62, %v761_v12  ;;  %v827_v12 = vld [vmem:[%s2096_s4 + $0x60] sm:$0xff] }
 0x1ea   :  { %1542 = vmatpush3.bf16.msra.mxu1 %v1783_v7 }
 0x1eb   :  { %1543 = vmatprep.subr.bf16.mxu1 %v1719_v3 }
 0x1ee   :  { %1545 = vmatpush3.bf16.msra.mxu1 %v1803_v14 }
 0x1ef   :  { %1546 = vmatprep.subr.bf16.mxu1 %v1719_v3 }
 0x1f2   :  { %1548 = vmatpush3.bf16.msra.mxu1 %v1818_v18 }
 0x1f3   :  { %1549 = vmatprep.subr.bf16.mxu1 %v1719_v3 }
 0x1f6   :  { %1551 = vmatpush3.bf16.msra.mxu1 %v1832_v21 }
 0x1f7   :  { %1552 = vmatprep.subr.bf16.mxu1 %v1719_v3 }
 0x1fa   :  { %1554 = vmatpush3.bf16.msra.mxu1 %v1844_v24 }
 0x1fb   :  { %1555 = vmatprep.subr.bf16.mxu1 %v1719_v3 }
 0x1fe   :  { %1557 = vmatpush3.bf16.msra.mxu1 %v1856_v27 }
 0x1ff   :  { %1558 = vmatprep.subr.bf16.mxu1 %v1719_v3 }
 0x202   :  { %1560 = vmatpush3.bf16.msra.mxu1 %v1868_v30 }
 0x203   :  { %1585 = vmatprep.subr.bf16.mxu1 %v1719_v3 }
 0x2b8   :  { %v363_v9 = vpop.f32.mrb[2].mxu1 }
 0x2b9   :  { %v367_v10 = vadd.f32 %v363_v9, %v296_v8  ;;  %v1226_v11 = vpop.f32.mrb[3].mxu1  ;;  %v824_v8 = vld [vmem:[%s2096_s4 + $0x48] sm:$0xff]  ;;  %v825_v9 = vld [vmem:[%s2096_s4 + $0x50] sm:$0xff] }
 0x2ba   :  { %v1649_v56 = vpack.c.bf16 %v824_v8, %v823_v5 }
 0x2bb   :  { %1675 = vtanh.f32 %v367_v10  ;;  %v826_v10 = vld [vmem:[%s2096_s4 + $0x58] sm:$0xff] }
 0x2bc   :  { %v1653_v11 = vpack.c.bf16 %v826_v10, %v825_v9 }
 0x2c5   :  { %v1676_v13 = vpop.eup %1675 }
 0x2c6   :  { %1260 = vmatmul.mubr.f32.vlgmr.msra.gmra.mrb[4].mxu0 %v1676_v13  ;;  %v764_v16 = vrot.slane %v1676_v13, 6  ;;  %v784_v17 = vrot.slane %v1676_v13, 7  ;;  %v828_v13 = vld [vmem:[%s2096_s4 + $0x68] sm:$0xff] }
 0x2c7   :  { %1563 = vmatpush3.bf16.msra.mxu0 %v1775_v4  ;;  %1329 = vmatprep.mubr.msk.f32.mxu0 %vm1720_vm1, %v1721_v6  ;;  %v1657_v15 = vpack.c.bf16 %v828_v13, %v827_v12 }
 0x2c8   :  { %1564 = vmatprep.subr.bf16.mxu0 %v1719_v3  ;;  %v797_v22 = vsel %vm140_vm3, %v796_v19, %v764_v16  ;;  %v809_v23 = vsel %vm140_vm3, %v808_v20, %v784_v17  ;;  %v829_v16 = vld [vmem:[%s2096_s4 + $0x70] sm:$0xff]  ;;  %v830_v17 = vld [vmem:[%s2096_s4 + $0x78] sm:$0xff]  ;;  %v686_v20 = vsel %vm140_vm3, %v1919_v57, 0.0  ;;  %v956_v57 = vld [vmem:[%s2097_s5] ss:$0 sm:$0xff]  ;;  %s1722_s5 = smov [#allocation2]  }
 0x2c9   :  { %v1661_v19 = vpack.c.bf16 %v830_v17, %v829_v16 }
 0x2cb   :  { %1566 = vmatpush3.bf16.msra.mxu0 %v1783_v7 }
 0x2cc   :  { %1567 = vmatprep.subr.bf16.mxu0 %v1719_v3 }
 0x2cf   :  { %1569 = vmatpush3.bf16.msra.mxu0 %v1803_v14 }
 0x2d0   :  { %1570 = vmatprep.subr.bf16.mxu0 %v1719_v3 }
 0x2d3   :  { %1572 = vmatpush3.bf16.msra.mxu0 %v1818_v18 }
 0x2d4   :  { %1573 = vmatprep.subr.bf16.mxu0 %v1719_v3 }
 0x2d7   :  { %1575 = vmatpush3.bf16.msra.mxu0 %v1832_v21 }
 0x2d8   :  { %1576 = vmatprep.subr.bf16.mxu0 %v1719_v3 }
 0x2db   :  { %1578 = vmatpush3.bf16.msra.mxu0 %v1844_v24 }
 0x2dc   :  { %1579 = vmatprep.subr.bf16.mxu0 %v1719_v3 }
 0x2df   :  { %1581 = vmatpush3.bf16.msra.mxu0 %v1856_v27 }
 0x2e0   :  { %1582 = vmatprep.subr.bf16.mxu0 %v1719_v3 }
 0x2e3   :  { %1584 = vmatpush3.bf16.msra.mxu0 %v1868_v30 }
 0x2e4   :  { %1609 = vmatprep.subr.bf16.mxu0 %v1719_v3 }
 0x399   :  { %v441_v26 = vpop.f32.mrb[4].mxu0 }
 0x39a   :  { %v445_v28 = vadd.f32 %v441_v26, %v374_v25  ;;  %v1261_v29 = vpop.f32.mrb[5].mxu0 }
 0x39c   :  { %1677 = vtanh.f32 %v445_v28 }
 0x3a6   :  { %v1678_v31 = vpop.eup %1677 }
 0x3a7   :  { %1295 = vmatmul.mubr.f32.vlgmr.msra.gmra.mrb[4].mxu1 %v1678_v31  ;;  %v767_v32 = vrot.slane %v1678_v31, 5  ;;  %v786_v33 = vrot.slane %v1678_v31, 6 }
 0x3a8   :  { %1587 = vmatpush3.bf16.msra.mxu1 %v1775_v4  ;;  %1364 = vmatprep.mubr.msk.f32.mxu1 %vm1720_vm1, %v1721_v6 }
 0x3a9   :  { %1588 = vmatprep.subr.bf16.mxu1 %v1719_v3  ;;  %v799_v34 = vsel %vm798_vm4, %v797_v22, %v767_v32  ;;  %v810_v35 = vsel %vm798_vm4, %v809_v23, %v786_v33 }
 0x3ac   :  { %1590 = vmatpush3.bf16.msra.mxu1 %v1783_v7 }
 0x3ad   :  { %1591 = vmatprep.subr.bf16.mxu1 %v1719_v3 }
 0x3b0   :  { %1593 = vmatpush3.bf16.msra.mxu1 %v1803_v14 }
 0x3b1   :  { %1594 = vmatprep.subr.bf16.mxu1 %v1719_v3 }
 0x3b4   :  { %1596 = vmatpush3.bf16.msra.mxu1 %v1818_v18 }
 0x3b5   :  { %1597 = vmatprep.subr.bf16.mxu1 %v1719_v3 }
 0x3b8   :  { %1599 = vmatpush3.bf16.msra.mxu1 %v1832_v21 }
 0x3b9   :  { %1600 = vmatprep.subr.bf16.mxu1 %v1719_v3 }
 0x3bc   :  { %1602 = vmatpush3.bf16.msra.mxu1 %v1844_v24 }
 0x3bd   :  { %1603 = vmatprep.subr.bf16.mxu1 %v1719_v3 }
 0x3c0   :  { %1605 = vmatpush3.bf16.msra.mxu1 %v1856_v27 }
 0x3c1   :  { %1606 = vmatprep.subr.bf16.mxu1 %v1719_v3 }
 0x3c4   :  { %1608 = vmatpush3.bf16.msra.mxu1 %v1868_v30 }
 0x47a   :  { %v519_v37 = vpop.f32.mrb[4].mxu1 }
 0x47b   :  { %v523_v38 = vadd.f32 %v519_v37, %v452_v36  ;;  %v1296_v39 = vpop.f32.mrb[5].mxu1 }
 0x47d   :  { %1679 = vtanh.f32 %v523_v38 }
 0x487   :  { %v1680_v40 = vpop.eup %1679 }
 0x488   :  { %1330 = vmatmul.mubr.f32.vlgmr.msra.gmra.mrb[6].mxu0 %v1680_v40  ;;  %v770_v41 = vrot.slane %v1680_v40, 4  ;;  %v788_v42 = vrot.slane %v1680_v40, 5 }
 0x489   :  { %1611 = vmatpush3.bf16.msra.mxu0 %v1775_v4  ;;  %1399 = vmatprep.mubr.msk.f32.mxu0 %vm1720_vm1, %v1721_v6  ;;  %v530_v4 = vsel %vm140_vm3, %v1913_v52, 0.0  ;;  %v1641_v52 = vpack.c.bf16 %v820_v51, %v819_v50 }
 0x48a   :  { %1612 = vmatprep.subr.bf16.mxu0 %v1719_v3  ;;  %v801_v43 = vsel %vm800_vm5, %v799_v34, %v770_v41  ;;  %v811_v44 = vsel %vm800_vm5, %v810_v35, %v788_v42 }
 0x48d   :  { %1614 = vmatpush3.bf16.msra.mxu0 %v1783_v7 }
 0x48e   :  { %1615 = vmatprep.subr.bf16.mxu0 %v1719_v3 }
 0x491   :  { %1617 = vmatpush3.bf16.msra.mxu0 %v1803_v14 }
 0x492   :  { %1618 = vmatprep.subr.bf16.mxu0 %v1719_v3 }
 0x495   :  { %1620 = vmatpush3.bf16.msra.mxu0 %v1818_v18 }
 0x496   :  { %1621 = vmatprep.subr.bf16.mxu0 %v1719_v3 }
 0x499   :  { %1623 = vmatpush3.bf16.msra.mxu0 %v1832_v21 }
 0x49a   :  { %1624 = vmatprep.subr.bf16.mxu0 %v1719_v3 }
 0x49d   :  { %1626 = vmatpush3.bf16.msra.mxu0 %v1844_v24 }
 0x49e   :  { %1627 = vmatprep.subr.bf16.mxu0 %v1719_v3 }
 0x4a1   :  { %1629 = vmatpush3.bf16.msra.mxu0 %v1856_v27  ;;  %v816_v27 = vld [vmem:[%s2096_s4 + $0x8] sm:$0xff] }
 0x4a2   :  { %1630 = vmatprep.subr.bf16.mxu0 %v1719_v3  ;;  %v815_v3 = vld [vmem:[%s2096_s4] sm:$0xff] }
 0x4a3   :  { %v1633_v47 = vpack.c.bf16 %v816_v27, %v815_v3 }
 0x4a5   :  { %1632 = vmatpush3.bf16.msra.mxu0 %v1868_v30  ;;  %v817_v30 = vld [vmem:[%s2096_s4 + $0x10] sm:$0xff]  ;;  %1634 = vmatprep.subr.bf16.mxu1 %v1633_v47 }
 0x4a6   :  { %v1637_v49 = vpack.c.bf16 %v818_v48, %v817_v30 }
 0x55b   :  { %v597_v6 = vpop.f32.mrb[6].mxu0 }
 0x55c   :  { %v601_v7 = vadd.f32 %v597_v6, %v530_v4  ;;  %v1331_v14 = vpop.f32.mrb[7].mxu0 }
 0x55e   :  { %1681 = vtanh.f32 %v601_v7 }
 0x568   :  { %v1682_v18 = vpop.eup %1681 }
 0x569   :  { %1365 = vmatmul.mubr.f32.vlgmr.msra.gmra.mrb[6].mxu1 %v1682_v18  ;;  %v773_v21 = vrot.slane %v1682_v18, 3  ;;  %v790_v24 = vrot.slane %v1682_v18, 4 }
 0x56a   :  { %1636 = vmatpush3.bf16.msra.mxu1 %v1633_v47 }
 0x56b   :  { %v803_v45 = vsel %vm802_vm6, %v801_v43, %v773_v21  ;;  %v812_v46 = vsel %vm802_vm6, %v811_v44, %v790_v24  ;;  %1638 = vmatprep.subr.bf16.mxu1 %v1637_v49 }
 0x56e   :  { %1640 = vmatpush3.bf16.msra.mxu1 %v1637_v49 }
 0x56f   :  { %1642 = vmatprep.subr.bf16.mxu1 %v1641_v52 }
 0x572   :  { %1644 = vmatpush3.bf16.msra.mxu1 %v1641_v52 }
 0x573   :  { %1646 = vmatprep.subr.bf16.mxu1 %v1645_v55 }
 0x576   :  { %1648 = vmatpush3.bf16.msra.mxu1 %v1645_v55 }
 0x577   :  { %1650 = vmatprep.subr.bf16.mxu1 %v1649_v56 }
 0x57a   :  { %1652 = vmatpush3.bf16.msra.mxu1 %v1649_v56 }
 0x57b   :  { %1654 = vmatprep.subr.bf16.mxu1 %v1653_v11 }
 0x57e   :  { %1656 = vmatpush3.bf16.msra.mxu1 %v1653_v11 }
 0x57f   :  { %1658 = vmatprep.subr.bf16.mxu1 %v1657_v15 }
 0x582   :  { %1660 = vmatpush3.bf16.msra.mxu1 %v1657_v15 }
 0x583   :  { %1662 = vmatprep.subr.bf16.mxu1 %v1661_v19 }
 0x586   :  { %1664 = vmatpush3.bf16.msra.mxu1 %v1661_v19 }
 0x63c   :  { %v675_v59 = vpop.f32.mrb[6].mxu1 }
 0x63d   :  { %v679_v60 = vadd.f32 %v675_v59, %v608_v58  ;;  %v1366_v61 = vpop.f32.mrb[7].mxu1 }
 0x63f   :  { %1683 = vtanh.f32 %v679_v60 }
 0x649   :  { %v1684_v62 = vpop.eup %1683 }
 0x64a   :  { %1400 = vmatmul.mubr.f32.vlgmr.msra.gmra.mrb[8].mxu0 %v1684_v62  ;;  %v776_v63 = vrot.slane %v1684_v62, 2  ;;  %v792_v0 = vrot.slane %v1684_v62, 3 }
 0x64c   :  { %v805_v1 = vsel %vm804_vm7, %v803_v45, %v776_v63  ;;  %v813_v2 = vsel %vm804_vm7, %v812_v46, %v792_v0 }
 0x71d   :  { %v753_v22 = vpop.f32.mrb[8].mxu0 }
 0x71e   :  { %v757_v23 = vadd.f32 %v753_v22, %v686_v20  ;;  %v1401_v25 = vpop.f32.mrb[9].mxu0 }
 0x720   :  { %1685 = vtanh.f32 %v757_v23 }
 0x72a   :  { %v1686_v26 = vpop.eup %1685 }
 0x72b   :  { %759 = vst [vmem:[%s2099_s7] sm:$0xff] %v1686_v26  ;;  %v779_v28 = vrot.slane %v1686_v26, 1  ;;  %v794_v29 = vrot.slane %v1686_v26, 2  ;;  %s938_s7 = sshll.u32 %s1722_s5, 4  ;;  %s939_s7 = int_to_ptr.vmem [resolvable:$true] %s938_s7 }
 0x72c   :  { %s1695_s23 = scalar_lea.vmem %s939_s7, 256  ;;  %p1700_p1 = scmp.lt.s32.totalorder %s939_s7, %s939_s7 }
 0x72d   :  { %v807_v31 = vsel %vm806_vm8, %v805_v1, %v779_v28  ;;  %v814_v32 = vsel %vm806_vm8, %v813_v2, %v794_v29  ;;  %p1696_p0 = scmp.ne.s32.totalorder %s939_s7, %s1695_s23  ;;  %p1701_p2 = scmp.lt.s32.totalorder %s1695_s23, %s1695_s23 }
 0x72e   :  { %1434 = vmatprep.mubr.f32.mxu1 %v807_v31 }
 0x72f   :  { %1435 = vmatmul.mubr.f32.vlgmr.msra.gmra.mrb[8].mxu1 %v814_v32  ;;  %p1702_p3 = por %p1701_p2, %p1700_p1 }
 0x731   :  { %p1703_p4 = pnand %p1702_p3, %p1696_p0 }
 0x802   :  { %v1436_v33 = vpop.f32.mrb[8].mxu1 }
 0x803   :  { %v904_v34 = vpop.f32.mrb[9].mxu1  ;;  %v910_v36 = vadd.f32 %v1436_v33, %v956_v57 }
 0x804   :  { %v905_v35 = vadd.f32 %v956_v57, %v904_v34 }
 0x806   :  { %913 = vmax.xlane.f32.xlu0 %v905_v35 }
 0x80a   :  { %915 = vmax.xlane.f32.xlu0 %v910_v36 }
 0x893   :  { %v914_v37 = vpop.xlane.xlu0 %913 }
 0x894   :  { %v917_v38 = vsub.f32 %v905_v35, %v914_v37 }
 0x896   :  { %v919_v39 = vmul.f32 1.442695, %v917_v38 }
 0x897   :  { %v916_v40 = vpop.xlane.xlu0 %915 }
 0x898   :  { %1687 = vpow2.f32 %v919_v39  ;;  %v918_v41 = vsub.f32 %v910_v36, %v916_v40 }
 0x89a   :  { %v921_v42 = vmul.f32 1.442695, %v918_v41 }
 0x89c   :  { %1689 = vpow2.f32 %v921_v42 }
 0x8a2   :  { %v1688_v43 = vpop.eup %1687 }
 0x8a3   :  { %923 = vadd.xlane.f32.xlu1 %v1688_v43 }
 0x8a6   :  { %v1690_v44 = vpop.eup %1689 }
 0x8a7   :  { %925 = vadd.xlane.f32.xlu1 %v1690_v44 }
 0x930   :  { %v924_v4 = vpop.xlane.xlu1 %923 }
 0x931   :  { %1691 = vrcp.f32 %v924_v4 }
 0x934   :  { %v926_v6 = vpop.xlane.xlu1 %925 }
 0x935   :  { %1693 = vrcp.f32 %v926_v6 }
 0x93b   :  { %v1692_v7 = vpop.eup %1691 }
 0x93c   :  { %v928_v14 = vmul.f32 %v1692_v7, %v1688_v43 }
 0x93e   :  { %931 = vst [vmem:[#allocation2] sm:$0xff] %v928_v14 }
 0x93f   :  { %v1694_v18 = vpop.eup %1693 }
 0x940   :  { %v930_v21 = vmul.f32 %v1694_v18, %v1690_v44 }
 0x942   :  { %932 = vst [vmem:[#allocation2 + $0x8] sm:$0xff] %v930_v21 }
 0x943   :  { %1706 = shalt.err (!%p1703_p4)
}
 0x944   :  { %s1707_s25 = scalar_lea.hbm %s2098_s6, 256 }
 0x945   :  { %p1708_p5 = scmp.ne.s32.totalorder %s2098_s6, %s1707_s25  ;;  %p1711_p6 = scmp.lt.u32.totalorder %s1707_s25, %s2098_s6 }
 0x947   :  { %p1713_p7 = pnand %p1711_p6, %p1708_p5 }
 0x949   :  { %1716 = shalt.err (!%p1713_p7)
}
 0x94a   :  { %s1723_s30 = smov 128   ;;  %s1724_s8 = smov 8  }
 0x94b   :  { %944 = dma.vmem_to_hbm [thread:$0]  %s939_s7, 256, %s2098_s6, [#allocation3], %s1723_s30, %s1723_s30, %s1724_s8  }
 0x94c   :  { %1717 = dma.done.wait [#allocation3], 256  }
 0x94d   :  { %1718 = vsyncadd [#allocation3], 4294967040 }
 0x94e   :  { %952 = vsyncpa [#allocation3], 1 }

</bundles_post_ra>
